<compile_context>
chip_gen: v6e
topology: v6e:2x2x1
jax: 0.10.0
libtpu: 0.0.40
codegen_flags: <defaults>
</compile_context>

<pallas_src>
import functools

import jax
import jax.numpy as jnp
from jax.experimental import pallas as pl
from jax.experimental.pallas import tpu as pltpu


def temporal_kernel(x_ref, w1_ref, w2_ref, sh_ref, o_ref):
    """Whole TemporalNetwork forward in one invocation (two MXU passes)."""
    x = x_ref[...]                                                    # (B, Z)
    shifts = sh_ref[...]                                              # (2, Wpack)
    w1_cols = w1_ref.shape[1]                                         # n_bars*H
    out_cols = o_ref.shape[1]                                         # padded Z*n_bars

    # Layer 1: ConvTranspose2d(Z->H, k=(2,1)); BN1 scale pre-folded into w1 columns.
    h = jnp.dot(x, w1_ref[...], preferred_element_type=jnp.float32)   # (B, n_bars*H)
    h = jnp.maximum(h + shifts[0:1, :w1_cols], 0.0)                   # +shift, ReLU

    # Layer 2: ConvTranspose2d(H->Z, 1x1) as block-diagonal matmul; BN2 scale folded.
    o = jnp.dot(h, w2_ref[...], preferred_element_type=jnp.float32)   # (B, out_pad)
    o_ref[...] = jnp.maximum(o + shifts[1:2, :out_cols], 0.0)         # +shift, ReLU


def prepare_params(params, n_bars=2, eps=1e-5):
    """One-time parameter preparation (BN folding + weight restacking + padding).

    Run once at parameter-load time; the per-call wrapper only launches the kernel.
    """
    Z, H = params["w1"].shape[0], params["w1"].shape[1]

    # Fold conv bias + eval-mode BN into per-channel scale/shift:
    #   y = ((x@W + b) - rm) * g / sqrt(rv+eps) + be = (x@W)*sc + ((b-rm)*sc + be)
    sc1 = params["g1"] / jnp.sqrt(params["rv1"] + eps)                       # (H,)
    sh1 = (params["b1"] - params["rm1"]) * sc1 + params["be1"]               # (H,)
    sc2 = params["g2"] / jnp.sqrt(params["rv2"] + eps)                       # (Z,)
    sh2 = (params["b2"] - params["rm2"]) * sc2 + params["be2"]               # (Z,)

    # W1: (Z, H, n_bars, 1) -> stacked (Z, n_bars*H), column index = t*H + c.
    # Fold the BN1 scale into the columns (scale depends only on c).
    w1s = jnp.transpose(params["w1"][..., 0], (0, 2, 1)).reshape(Z, n_bars * H)
    w1s = w1s * jnp.tile(sc1, n_bars)[None, :]
    sh1s = jnp.tile(sh1, n_bars)                                             # (n_bars*H,)

    # W2: (H, Z, 1, 1) -> block-"diagonal" (n_bars*H, Z*n_bars):
    #   w2bd[t*H + c, z*n_bars + u] = W2[c, z] * sc2[z] * (t == u)
    # so the second matmul's output columns are already (z, t)-ordered.
    w2 = params["w2"][:, :, 0, 0] * sc2[None, :]                             # (H, Z)
    eye = jnp.eye(n_bars, dtype=w2.dtype)
    w2bd = jnp.einsum("cz,tu->tczu", w2, eye).reshape(n_bars * H, Z * n_bars)
    sh2s = jnp.repeat(sh2, n_bars)                                           # (Z*n_bars,)

    # Lane-dense output: zero-pad output columns up to a multiple of 128 so the final
    # store is an unmasked full-lane vst. Pad columns stay exactly zero (ReLU(0+0)=0).
    out_cols = Z * n_bars
    out_pad = ((out_cols + 127) // 128) * 128
    if out_pad != out_cols:
        w2bd = jnp.pad(w2bd, ((0, 0), (0, out_pad - out_cols)))
        sh2s = jnp.pad(sh2s, (0, out_pad - out_cols))

    # Pack both shift vectors into a single (2, Wpack) input (one DMA instead of two).
    w1_cols = n_bars * H
    wpack = max(w1_cols, out_pad)
    shifts = jnp.zeros((2, wpack), jnp.float32)
    shifts = shifts.at[0, :w1_cols].set(sh1s)
    shifts = shifts.at[1, :out_pad].set(sh2s)

    return {"w1s": w1s, "w2bd": w2bd, "shifts": shifts}


def temporal_network(x, prep, n_bars=2):
    """Pallas wrapper reproducing TemporalNetwork.forward (eval-mode BN)."""
    B = x.shape[0]
    Z = prep["w1s"].shape[0]
    out_pad = prep["w2bd"].shape[1]

    vmem = pltpu.MemorySpace.VMEM
    out = pl.pallas_call(
        temporal_kernel,
        out_shape=jax.ShapeDtypeStruct((B, out_pad), jnp.float32),
        in_specs=[pl.BlockSpec(memory_space=vmem) for _ in range(4)],
        out_specs=pl.BlockSpec(memory_space=vmem),
    )(x, prep["w1s"], prep["w2bd"], prep["shifts"])

    # Columns are already (z, t)-ordered; drop the zero pad columns and do a pure
    # metadata reshape to the PyTorch output layout (B, Z, n_bars).
    return out[:, :Z * n_bars].reshape(B, Z, n_bars)


def init_params(key, z_dim, hid, n_bars=2):
    ks = jax.random.split(key, 12)
    return {
        # ConvTranspose2d(z_dim, hid, kernel_size=(2, 1)) weight: (z, hid, 2, 1)
        "w1": 0.1 * jax.random.normal(ks[0], (z_dim, hid, n_bars, 1), jnp.float32),
        "b1": 0.1 * jax.random.normal(ks[1], (hid,), jnp.float32),
        # BatchNorm2d(hid) params + running stats (eval mode)
        "g1": 1.0 + 0.1 * jax.random.normal(ks[2], (hid,), jnp.float32),
        "be1": 0.1 * jax.random.normal(ks[3], (hid,), jnp.float32),
        "rm1": 0.05 * jax.random.normal(ks[4], (hid,), jnp.float32),
        "rv1": jnp.abs(1.0 + 0.1 * jax.random.normal(ks[5], (hid,), jnp.float32)),
        # ConvTranspose2d(hid, z_dim, kernel_size=(1, 1)) weight: (hid, z, 1, 1)
        "w2": 0.1 * jax.random.normal(ks[6], (hid, z_dim, 1, 1), jnp.float32),
        "b2": 0.1 * jax.random.normal(ks[7], (z_dim,), jnp.float32),
        # BatchNorm2d(z_dim) params + running stats (eval mode)
        "g2": 1.0 + 0.1 * jax.random.normal(ks[8], (z_dim,), jnp.float32),
        "be2": 0.1 * jax.random.normal(ks[9], (z_dim,), jnp.float32),
        "rm2": 0.05 * jax.random.normal(ks[10], (z_dim,), jnp.float32),
        "rv2": jnp.abs(1.0 + 0.1 * jax.random.normal(ks[11], (z_dim,), jnp.float32)),
    }


def reference(x, p, eps=1e-5):
    """Pure-JAX reference following the PyTorch ops directly (eval-mode BN)."""
    # ConvTranspose2d on (B, Z, 1, 1): out[b,c,t] = sum_z x[b,z] * W1[z,c,t] + b1[c]
    h = jnp.einsum("bz,zct->bct", x, p["w1"][..., 0]) + p["b1"][None, :, None]
    h = (h - p["rm1"][None, :, None]) / jnp.sqrt(p["rv1"] + eps)[None, :, None]
    h = h * p["g1"][None, :, None] + p["be1"][None, :, None]
    h = jnp.maximum(h, 0.0)
    # ConvTranspose2d 1x1: out[b,k,t] = sum_c h[b,c,t] * W2[c,k] + b2[k]
    o = jnp.einsum("bct,ck->bkt", h, p["w2"][:, :, 0, 0]) + p["b2"][None, :, None]
    o = (o - p["rm2"][None, :, None]) / jnp.sqrt(p["rv2"] + eps)[None, :, None]
    o = o * p["g2"][None, :, None] + p["be2"][None, :, None]
    return jnp.maximum(o, 0.0)                                       # (B, Z, n_bars)


if __name__ == "__main__":
    # B=8 fills all 8 sublanes of a vreg (batching along B is the main throughput lever).
    B, Z, H, N_BARS = 8, 32, 64, 2

    key = jax.random.PRNGKey(0)
    k_x, k_p = jax.random.split(key)
    x = jax.random.normal(k_x, (B, Z), jnp.float32)
    params = init_params(k_p, z_dim=Z, hid=H, n_bars=N_BARS)

    # One-time parameter preparation (BN folding / weight restacking / padding).
    prep = jax.tree_util.tree_map(jax.block_until_ready,
                                  prepare_params(params, n_bars=N_BARS))

    fwd = jax.jit(functools.partial(temporal_network, n_bars=N_BARS))
    out = jax.block_until_ready(fwd(x, prep))

    ref = reference(x, params)
    assert out.shape == (B, Z, N_BARS), out.shape
    assert jnp.allclose(out, ref, atol=1e-4, rtol=1e-4), "mismatch vs reference"
    print("KERNEL_OK")
</pallas_src>

<mosaic_0001>
module attributes {stable_mosaic.version = 11 : i64} {
  func.func @temporal_kernel(%arg0: memref<8x32xf32, #tpu.memory_space<vmem>>, %arg1: memref<32x128xf32, #tpu.memory_space<vmem>>, %arg2: memref<128x128xf32, #tpu.memory_space<vmem>>, %arg3: memref<2x128xf32, #tpu.memory_space<vmem>>, %arg4: memref<8x128xf32, #tpu.memory_space<vmem>>) attributes {dimension_semantics = [], scalar_prefetch = 0 : i64, scratch_operands = 0 : i64, tpu.core_type = #tpu.core_type<tc>} {
    %c0 = arith.constant 0 : index
    %c0_0 = arith.constant 0 : index
    %0 = vector.load %arg0[%c0, %c0_0] : memref<8x32xf32, #tpu.memory_space<vmem>>, vector<8x32xf32>
    %c0_1 = arith.constant 0 : index
    %c0_2 = arith.constant 0 : index
    %1 = vector.load %arg3[%c0_1, %c0_2] : memref<2x128xf32, #tpu.memory_space<vmem>>, vector<2x128xf32>
    %c0_3 = arith.constant 0 : index
    %c0_4 = arith.constant 0 : index
    %2 = vector.load %arg1[%c0_3, %c0_4] : memref<32x128xf32, #tpu.memory_space<vmem>>, vector<32x128xf32>
    %cst = arith.constant dense<0.000000e+00> : vector<8x128xf32>
    %3 = tpu.matmul %0, %2, %cst {dimension_numbers = #tpu.dot_dimension_numbers<[1], [0], [0], [1], [0, 0, 1, 1], [], []>} : vector<8x32xf32>, vector<32x128xf32>, vector<8x128xf32> -> vector<8x128xf32>
    %4 = vector.extract_strided_slice %1 {offsets = [0, 0], sizes = [1, 128], strides = [1, 1]} : vector<2x128xf32> to vector<1x128xf32>
    %5 = vector.broadcast %4 : vector<1x128xf32> to vector<8x128xf32>
    %6 = arith.addf %3, %5 : vector<8x128xf32>
    %cst_5 = arith.constant 0.000000e+00 : f32
    %7 = vector.broadcast %cst_5 : f32 to vector<8x128xf32>
    %8 = arith.maximumf %6, %7 : vector<8x128xf32>
    %c0_6 = arith.constant 0 : index
    %c0_7 = arith.constant 0 : index
    %9 = vector.load %arg2[%c0_6, %c0_7] : memref<128x128xf32, #tpu.memory_space<vmem>>, vector<128x128xf32>
    %cst_8 = arith.constant dense<0.000000e+00> : vector<8x128xf32>
    %10 = tpu.matmul %8, %9, %cst_8 {dimension_numbers = #tpu.dot_dimension_numbers<[1], [0], [0], [1], [0, 0, 1, 1], [], []>} : vector<8x128xf32>, vector<128x128xf32>, vector<8x128xf32> -> vector<8x128xf32>
    %11 = vector.extract_strided_slice %1 {offsets = [1, 0], sizes = [1, 128], strides = [1, 1]} : vector<2x128xf32> to vector<1x128xf32>
    %12 = vector.broadcast %11 : vector<1x128xf32> to vector<8x128xf32>
    %13 = arith.addf %10, %12 : vector<8x128xf32>
    %cst_9 = arith.constant 0.000000e+00 : f32
    %14 = vector.broadcast %cst_9 : f32 to vector<8x128xf32>
    %15 = arith.maximumf %13, %14 : vector<8x128xf32>
    %c0_10 = arith.constant 0 : index
    %c0_11 = arith.constant 0 : index
    %16 = vector.load %arg4[%c0_10, %c0_11] : memref<8x128xf32, #tpu.memory_space<vmem>>, vector<8x128xf32>
    tpu.vector_store %arg4[%c0_10, %c0_11], %15 {strides = array<i32>} : memref<8x128xf32, #tpu.memory_space<vmem>>, vector<8x128xf32>,
    return
  }
}

</mosaic_0001>

<bundles_post_ra>
// kernel: temporal_network.1
= control target key start
LH: loop header
LB: loop body
LE: loop exit
PB: predicated region body
PF: predicated region fallthrough
CT: control target
= control target key end

     0   :  { %9 = vsyncpa [#allocation3], 0  ;;  %s485_s0 = inlined_call_operand.hbm [shape: f32[8,32], index: 0, kind: input, shape index: {}]   ;;  %s486_s1 = inlined_call_operand.hbm [shape: f32[32,128], index: 1, kind: input, shape index: {}]   ;;  %s487_s2 = inlined_call_operand.hbm [shape: f32[128,128], index: 2, kind: input, shape index: {}]   ;;  %s488_s3 = inlined_call_operand.hbm [shape: f32[2,128], index: 3, kind: input, shape index: {}]   ;;  %s489_s4 = inlined_call_operand.vmem [shape: f32[8,128], index: 4, kind: output, shape index: {}]  }
   0x1   :  { %10 = vsyncpa [#allocation5], 0 }
   0x2   :  { %11 = vsyncpa [#allocation8], 0  ;;  %s415_s15 = smov [#allocation4]  }
   0x3   :  { %s27_s16 = sshll.u32 %s415_s15, 4  ;;  %s28_s16 = int_to_ptr.vmem [resolvable:$true] %s27_s16 }
   0x4   :  { %s337_s17 = scalar_lea.vmem %s28_s16, 512  ;;  %p342_p1 = scmp.lt.s32.totalorder %s28_s16, %s28_s16 }
   0x5   :  { %p338_p0 = scmp.ne.s32.totalorder %s28_s16, %s337_s17  ;;  %p343_p2 = scmp.lt.s32.totalorder %s337_s17, %s337_s17 }
   0x7   :  { %p344_p3 = por %p343_p2, %p342_p1 }
   0x9   :  { %p345_p4 = pnand %p344_p3, %p338_p0 }
   0xb   :  { %348 = shalt.err (!%p345_p4)
}
   0xc   :  { %s416_s18 = smov 128   ;;  %s417_s19 = smov 8  }
   0xd   :  { %33 = dma.hbm_to_vmem [thread:$0]  %s486_s1, 512, %s28_s16, [#allocation5], %s416_s18, %s416_s18, %s417_s19  }
   0xe   :  { %s418_s22 = smov [#allocation2]   ;;  %s419_s24 = smov [#allocation6]  }
   0xf   :  { %s18_s23 = sshll.u32 %s418_s22, 4  ;;  %s39_s25 = sshll.u32 %s419_s24, 4  ;;  %s19_s23 = int_to_ptr.vmem [resolvable:$true] %s18_s23  ;;  %s40_s25 = int_to_ptr.vmem [resolvable:$true] %s39_s25 }
  0x10   :  { %s357_s26 = scalar_lea.vmem %s19_s23, 128  ;;  %p362_p6 = scmp.lt.s32.totalorder %s19_s23, %s19_s23 }
  0x11   :  { %p358_p5 = scmp.ne.s32.totalorder %s19_s23, %s357_s26  ;;  %p363_p7 = scmp.lt.s32.totalorder %s357_s26, %s357_s26 }
  0x13   :  { %p364_p8 = por %p363_p7, %p362_p6 }
  0x15   :  { %p365_p9 = pnand %p364_p8, %p358_p5 }
  0x17   :  { %368 = shalt.err (!%p365_p9)
}
  0x18   :  { %21 = dma.hbm_to_vmem [thread:$0]  %s485_s0, 128, %s19_s23, [#allocation3]  }
  0x19   :  { %s377_s29 = scalar_lea.vmem %s40_s25, 2048  ;;  %p382_p11 = scmp.lt.s32.totalorder %s40_s25, %s40_s25 }
  0x1a   :  { %p378_p10 = scmp.ne.s32.totalorder %s40_s25, %s377_s29  ;;  %p383_p12 = scmp.lt.s32.totalorder %s377_s29, %s377_s29 }
  0x1c   :  { %p384_p13 = por %p383_p12, %p382_p11 }
  0x1e   :  { %p385_p0 = pnand %p384_p13, %p378_p10 }
  0x20   :  { %388 = shalt.err (!%p385_p0)
}
  0x21   :  { %45 = dma.hbm_to_vmem [thread:$0]  %s487_s2, 2048, %s40_s25, [#allocation5], %s416_s18, %s416_s18, %s417_s19  }
  0x22   :  { %s420_s5 = smov [#allocation7]  }
  0x23   :  { %s52_s6 = sshll.u32 %s420_s5, 4  ;;  %s53_s6 = int_to_ptr.vmem [resolvable:$true] %s52_s6 }
  0x24   :  { %s397_s7 = scalar_lea.vmem %s53_s6, 32  ;;  %p402_p2 = scmp.lt.s32.totalorder %s53_s6, %s53_s6 }
  0x25   :  { %p398_p1 = scmp.ne.s32.totalorder %s53_s6, %s397_s7  ;;  %p403_p3 = scmp.lt.s32.totalorder %s397_s7, %s397_s7 }
  0x27   :  { %p404_p4 = por %p403_p3, %p402_p2 }
  0x29   :  { %p405_p5 = pnand %p404_p4, %p398_p1 }
  0x2b   :  { %408 = shalt.err (!%p405_p5)
}
  0x2c   :  { %55 = dma.hbm_to_vmem [thread:$0]  %s488_s3, 32, %s53_s6, [#allocation8]  }
  0x2d   :  { %409 = dma.done.wait [#allocation3], 128  }
  0x2e   :  { %410 = vsyncadd [#allocation3], 4294967168 }
  0x2f   :  { %411 = dma.done.wait [#allocation5], 2560  }
  0x30   :  { %412 = vsyncadd [#allocation5], 4294964736 }
  0x31   :  { %413 = dma.done.wait [#allocation8], 32  }
  0x32   :  { %414 = vsyncadd [#allocation8], 4294967264  ;;  %v421_v0 = vmov 0.0   ;;  %vm422_vm0 = vmmov 0   ;;  %v73_v1 = vld [vmem:[#allocation4 + $0x18] sm:$0xff]  ;;  %v72_v2 = vld [vmem:[#allocation4 + $0x10] sm:$0xff]  ;;  %v74_v22 = vlaneseq }
  0x33   :  { %275 = vmatprep.subr.mxu0 %v421_v0  ;;  %283 = vmatprep.mubr.msk.f32.mxu0 %vm422_vm0, %v421_v0  ;;  %v168_v3 = vld [vmem:[#allocation6 + $0x78] sm:$0xff]  ;;  %v71_v4 = vld [vmem:[#allocation4 + $0x8] sm:$0xff]  ;;  %v167_v5 = vld [vmem:[#allocation6 + $0x70] sm:$0xff]  ;;  %vm78_vm1 = vcmask 261120  }
  0x34   :  { %286 = vmatprep.subr.mxu1 %v421_v0  ;;  %318 = vmatprep.mubr.msk.f32.mxu1 %vm422_vm0, %v421_v0  ;;  %v166_v6 = vld [vmem:[#allocation6 + $0x68] sm:$0xff]  ;;  %v70_v7 = vld [vmem:[#allocation4] sm:$0xff]  ;;  %v68_v8 = vld [vmem:[#allocation2] sm:$0xff]  ;;  %v75_v23 = vshrl.u32 %v74_v22, 7 }
  0x35   :  { %276 = vmatpush3.msra.mxu0 %v73_v1  ;;  %287 = vmatpush3.msra.mxu1 %v168_v3  ;;  %v165_v9 = vld [vmem:[#allocation6 + $0x60] sm:$0xff]  ;;  %v164_v10 = vld [vmem:[#allocation6 + $0x58] sm:$0xff]  ;;  %v163_v11 = vld [vmem:[#allocation6 + $0x50] sm:$0xff] }
  0x36   :  { %277 = vmatprep.subr.mxu0 %v421_v0  ;;  %288 = vmatprep.subr.mxu1 %v421_v0  ;;  %v162_v12 = vld [vmem:[#allocation6 + $0x48] sm:$0xff]  ;;  %v161_v13 = vld [vmem:[#allocation6 + $0x40] sm:$0xff]  ;;  %v160_v14 = vld [vmem:[#allocation6 + $0x38] sm:$0xff]  ;;  %v76_v24 = vsub.s32 0, %v75_v23  ;;  %v171_v31 = vsub.s32 1, %v75_v23 }
  0x37   :  { %278 = vmatpush3.msra.mxu0 %v72_v2  ;;  %289 = vmatpush3.msra.mxu1 %v167_v5  ;;  %v159_v15 = vld [vmem:[#allocation6 + $0x30] sm:$0xff]  ;;  %v158_v16 = vld [vmem:[#allocation6 + $0x28] sm:$0xff]  ;;  %v157_v17 = vld [vmem:[#allocation6 + $0x20] sm:$0xff] }
  0x38   :  { %279 = vmatprep.subr.mxu0 %v421_v0  ;;  %290 = vmatprep.subr.mxu1 %v421_v0  ;;  %v156_v18 = vld [vmem:[#allocation6 + $0x18] sm:$0xff]  ;;  %v155_v19 = vld [vmem:[#allocation6 + $0x10] sm:$0xff]  ;;  %v154_v20 = vld [vmem:[#allocation6 + $0x8] sm:$0xff] }
  0x39   :  { %280 = vmatpush3.msra.mxu0 %v71_v4  ;;  %291 = vmatpush3.msra.mxu1 %v166_v6  ;;  %v153_v21 = vld [vmem:[#allocation6] sm:$0xff] }
  0x3a   :  { %281 = vmatprep.subr.mxu0 %v421_v0  ;;  %292 = vmatprep.subr.mxu1 %v421_v0  ;;  %v69_v25 = vld [vmem:[#allocation7] sm:$0x3] }
  0x3b   :  { %282 = vmatpush3.msra.mxu0 %v70_v7  ;;  %293 = vmatpush3.msra.mxu1 %v165_v9  ;;  %v77_v26 = vrot.slane %v69_v25, %v76_v24  ;;  %v172_v32 = vrot.slane %v69_v25, %v171_v31 }
  0x3c   :  { %284 = vmatmul.mubr.msk.f32.vlgmr.msra.gmra.mxu0 %vm78_vm1, %v68_v8  ;;  %294 = vmatprep.subr.mxu1 %v421_v0 }
  0x3d   :  { %295 = vmatpush3.msra.mxu1 %v164_v10 }
  0x3e   :  { %296 = vmatprep.subr.mxu1 %v421_v0 }
  0x3f   :  { %297 = vmatpush3.msra.mxu1 %v163_v11 }
  0x40   :  { %298 = vmatprep.subr.mxu1 %v421_v0 }
  0x41   :  { %299 = vmatpush3.msra.mxu1 %v162_v12 }
  0x42   :  { %300 = vmatprep.subr.mxu1 %v421_v0 }
  0x43   :  { %301 = vmatpush3.msra.mxu1 %v161_v13 }
  0x44   :  { %302 = vmatprep.subr.mxu1 %v421_v0 }
  0x45   :  { %303 = vmatpush3.msra.mxu1 %v160_v14 }
  0x46   :  { %304 = vmatprep.subr.mxu1 %v421_v0 }
  0x47   :  { %305 = vmatpush3.msra.mxu1 %v159_v15 }
  0x48   :  { %306 = vmatprep.subr.mxu1 %v421_v0 }
  0x49   :  { %307 = vmatpush3.msra.mxu1 %v158_v16 }
  0x4a   :  { %308 = vmatprep.subr.mxu1 %v421_v0 }
  0x4b   :  { %309 = vmatpush3.msra.mxu1 %v157_v17 }
  0x4c   :  { %310 = vmatprep.subr.mxu1 %v421_v0 }
  0x4d   :  { %311 = vmatpush3.msra.mxu1 %v156_v18 }
  0x4e   :  { %312 = vmatprep.subr.mxu1 %v421_v0 }
  0x4f   :  { %313 = vmatpush3.msra.mxu1 %v155_v19 }
  0x50   :  { %314 = vmatprep.subr.mxu1 %v421_v0 }
  0x51   :  { %315 = vmatpush3.msra.mxu1 %v154_v20 }
  0x52   :  { %316 = vmatprep.subr.mxu1 %v421_v0 }
  0x53   :  { %317 = vmatpush3.msra.mxu1 %v153_v21 }
  0xfc   :  { %v148_v27 = vpop.f32.mrf.mxu0 }
  0xfd   :  { %v149_v28 = vadd.f32 %v148_v27, %v77_v26 }
  0xfe   :  { %v285_v29 = vpop.f32.mrf.mxu0 }
  0xff   :  { %v152_v30 = vmax.f32 %v149_v28, 0.0 }
 0x101   :  { %319 = vmatmul.mubr.f32.vlgmr.msra.gmra.mxu1 %v152_v30 }
 0x1c1   :  { %v239_v33 = vpop.f32.mrf.mxu1 }
 0x1c2   :  { %v240_v34 = vadd.f32 %v239_v33, %v172_v32 }
 0x1c3   :  { %v320_v35 = vpop.f32.mrf.mxu1 }
 0x1c4   :  { %v243_v36 = vmax.f32 %v240_v34, 0.0 }
 0x1c6   :  { %244 = vst [vmem:[%s489_s4] sm:$0xff] %v243_v36 }
 0x1c7   :  { %249 = vsyncpa [#allocation3], 1 }
 0x1c8   :  { %250 = vsyncpa [#allocation5], 1 }
 0x1c9   :  { %251 = vsyncpa [#allocation8], 1 }

</bundles_post_ra>
